<compile_context>
chip_gen: v7x
topology: tpu7x:2x2x1
jax: 0.10.0
libtpu: 0.0.40
codegen_flags: <defaults>
</compile_context>

<pallas_src>
import jax
import jax.numpy as jnp
from jax import lax
from jax.experimental import pallas as pl
from jax.experimental.pallas import tpu as pltpu

IN_FEATURES = 512
HIDDEN = 128
OUT_FEATURES = 1


def _round_up(n, m):
    return ((n + m - 1) // m) * m


def mlp_kernel(x_ref, w1_ref, b1_ref, w2_ref, b2_ref, o_ref):
    # fc1 on the MXU: (TB, 512) bf16 @ (512, 128) bf16 -> (TB, 128) with f32 accumulate.
    xv = x_ref[...].astype(jnp.bfloat16)
    w1v = w1_ref[...].astype(jnp.bfloat16)
    h = jnp.dot(xv, w1v, preferred_element_type=jnp.float32)
    h = jnp.maximum(h + b1_ref[...], 0.0)            # bias + ReLU on the VPU

    # fc2 computed transposed: (1, 128) . (TB, 128) contracting the feature dim -> (1, TB).
    # Keeps the output block lane-dense (batch on lanes) -> unmasked full-lane stores.
    y_t = lax.dot_general(
        w2_ref[...], h,
        dimension_numbers=(((1,), (1,)), ((), ())),
        preferred_element_type=jnp.float32)
    y_t = y_t + b2_ref[0, 0]                         # scalar bias read from SMEM
    o_ref[...] = y_t.astype(o_ref.dtype)


def batch_model_forward(x, w1, b1, w2, b2, *, batch_tile=1024):
    """Returns relu(x @ w1 + b1) @ w2^T + b2 as a (B, 1) float32 array."""
    B, F = x.shape
    assert F == IN_FEATURES
    assert batch_tile % 128 == 0 and batch_tile % 8 == 0

    # Tile selection:
    #  * B >= 256: 128-aligned tiles, capped at batch_tile and sized so the grid has >= 2
    #    steps (the "parallel" axis then shards across v7x's two TensorCores).
    #  * small B: a single tile covering the whole (8-row-padded) batch.
    if B >= 256:
        tile = min(batch_tile, _round_up(pl.cdiv(B, 2), 128))
    else:
        tile = _round_up(B, 8)
    Bp = _round_up(B, tile)
    if Bp != B:
        x = jnp.pad(x, ((0, Bp - B), (0, 0)))        # zero tail rows, sliced off below
    grid = (Bp // tile,)

    out_t = pl.pallas_call(
        mlp_kernel,
        out_shape=jax.ShapeDtypeStruct((1, Bp), jnp.float32),
        grid_spec=pl.GridSpec(
            grid=grid,
            in_specs=[
                pl.BlockSpec((tile, IN_FEATURES), lambda i: (i, 0)),          # x tile
                pl.BlockSpec((IN_FEATURES, HIDDEN), lambda i: (0, 0)),        # w1 (resident)
                pl.BlockSpec((1, HIDDEN), lambda i: (0, 0)),                  # b1 (resident)
                pl.BlockSpec((1, HIDDEN), lambda i: (0, 0)),                  # w2 row (resident)
                pl.BlockSpec(memory_space=pltpu.MemorySpace.SMEM),            # b2 scalar
            ],
            out_specs=pl.BlockSpec((1, tile), lambda i: (0, i)),              # lane-dense out
        ),
        compiler_params=pltpu.CompilerParams(
            dimension_semantics=("parallel",),
            vmem_limit_bytes=32 * 1024 * 1024,
        ),
    )(x, w1, b1, w2, b2)

    # (1, Bp) -> (B, 1)
    return out_t[0, :B][:, None]


def init_params(key):
    # Mirrors PyTorch nn.Linear default init: U(-1/sqrt(fan_in), 1/sqrt(fan_in)).
    k1, k2, k3, k4 = jax.random.split(key, 4)
    lim1 = 1.0 / jnp.sqrt(IN_FEATURES)
    lim2 = 1.0 / jnp.sqrt(HIDDEN)
    # fc1 weight stored as (in, out) in bf16 so the kernel does x @ W1 on the MXU directly.
    w1 = jax.random.uniform(
        k1, (IN_FEATURES, HIDDEN), jnp.float32, -lim1, lim1).astype(jnp.bfloat16)
    b1 = jax.random.uniform(k2, (1, HIDDEN), jnp.float32, -lim1, lim1)
    # fc2 weight stored as a (1, 128) f32 row (same layout as PyTorch's (1, 128)).
    w2 = jax.random.uniform(k3, (1, HIDDEN), jnp.float32, -lim2, lim2)
    b2 = jax.random.uniform(k4, (1, OUT_FEATURES), jnp.float32, -lim2, lim2)
    return w1, b1, w2, b2


if __name__ == "__main__":
    key = jax.random.PRNGKey(0)
    kx, kp = jax.random.split(key)
    B = 16
    x = jax.random.normal(kx, (B, IN_FEATURES), jnp.float32).astype(jnp.bfloat16)
    w1, b1, w2, b2 = init_params(kp)

    out = batch_model_forward(x, w1, b1, w2, b2)
    out = jax.block_until_ready(out)
    assert out.shape == (B, OUT_FEATURES)

    # Correctness check against a plain-JAX f32 reference on the same (bf16-rounded) values.
    xf = x.astype(jnp.float32)
    w1f = w1.astype(jnp.float32)
    h_ref = jnp.maximum(xf @ w1f + b1, 0.0)
    ref = jnp.sum(h_ref * w2, axis=-1, keepdims=True) + b2[0, 0]
    assert jnp.allclose(out, ref, atol=1e-3, rtol=1e-3), float(jnp.max(jnp.abs(out - ref)))

    print("KERNEL_OK")
</pallas_src>

<mosaic_0001>
module attributes {stable_mosaic.version = 11 : i64} {
  func.func @mlp_kernel(%arg0: i32, %arg1: memref<16x512xbf16, #tpu.memory_space<vmem>>, %arg2: memref<512x128xbf16, #tpu.memory_space<vmem>>, %arg3: memref<1x128xf32, #tpu.memory_space<vmem>>, %arg4: memref<1x128xf32, #tpu.memory_space<vmem>>, %arg5: memref<1x1xf32, #tpu.memory_space<smem>>, %arg6: memref<1x16xf32, #tpu.memory_space<vmem>>) attributes {dimension_semantics = [#tpu.dimension_semantics<parallel>], iteration_bounds = array<i64: 1>, scalar_prefetch = 0 : i64, scratch_operands = 0 : i64, tpu.core_type = #tpu.core_type<tc>, window_params = [{transform_indices = @transform_0, window_bounds = array<i64: 16, 512>}, {pipeline_mode = #tpu.pipeline_mode<synchronous>, transform_indices = @transform_1, window_bounds = array<i64: 512, 128>}, {pipeline_mode = #tpu.pipeline_mode<synchronous>, transform_indices = @transform_2, window_bounds = array<i64: 1, 128>}, {pipeline_mode = #tpu.pipeline_mode<synchronous>, transform_indices = @transform_3, window_bounds = array<i64: 1, 128>}, {transform_indices = @transform_4, window_bounds = array<i64: 1, 1>}, {transform_indices = @transform_5, window_bounds = array<i64: 1, 16>}]} {
    %c0 = arith.constant 0 : index
    %c0_0 = arith.constant 0 : index
    %0 = vector.load %arg1[%c0, %c0_0] : memref<16x512xbf16, #tpu.memory_space<vmem>>, vector<16x512xbf16>
    %c0_1 = arith.constant 0 : index
    %c0_2 = arith.constant 0 : index
    %1 = vector.load %arg2[%c0_1, %c0_2] : memref<512x128xbf16, #tpu.memory_space<vmem>>, vector<512x128xbf16>
    %cst = arith.constant dense<0.000000e+00> : vector<16x128xf32>
    %2 = tpu.matmul %0, %1, %cst {dimension_numbers = #tpu.dot_dimension_numbers<[1], [0], [0], [1], [0, 0, 1, 1], [], []>} : vector<16x512xbf16>, vector<512x128xbf16>, vector<16x128xf32> -> vector<16x128xf32>
    %c0_3 = arith.constant 0 : index
    %c0_4 = arith.constant 0 : index
    %3 = vector.load %arg3[%c0_3, %c0_4] : memref<1x128xf32, #tpu.memory_space<vmem>>, vector<1x128xf32>
    %4 = vector.broadcast %3 : vector<1x128xf32> to vector<16x128xf32>
    %5 = arith.addf %2, %4 : vector<16x128xf32>
    %cst_5 = arith.constant 0.000000e+00 : f32
    %6 = vector.broadcast %cst_5 : f32 to vector<16x128xf32>
    %7 = arith.maximumf %5, %6 : vector<16x128xf32>
    %c0_6 = arith.constant 0 : index
    %c0_7 = arith.constant 0 : index
    %8 = vector.load %arg4[%c0_6, %c0_7] : memref<1x128xf32, #tpu.memory_space<vmem>>, vector<1x128xf32>
    %cst_8 = arith.constant dense<0.000000e+00> : vector<1x16xf32>
    %9 = tpu.matmul %8, %7, %cst_8 {dimension_numbers = #tpu.dot_dimension_numbers<[1], [1], [0], [0], [0, 0, 1, 0], [], []>} : vector<1x128xf32>, vector<16x128xf32>, vector<1x16xf32> -> vector<1x16xf32>
    %c0_9 = arith.constant 0 : index
    %c0_10 = arith.constant 0 : index
    %10 = memref.load %arg5[%c0_9, %c0_10] : memref<1x1xf32, #tpu.memory_space<smem>>
    %11 = vector.broadcast %10 : f32 to vector<1x16xf32>
    %12 = arith.addf %9, %11 : vector<1x16xf32>
    %c0_11 = arith.constant 0 : index
    %c0_12 = arith.constant 0 : index
    %13 = vector.load %arg6[%c0_11, %c0_12] : memref<1x16xf32, #tpu.memory_space<vmem>>, vector<1x16xf32>
    tpu.vector_store %arg6[%c0_11, %c0_12], %12 {strides = array<i32>} : memref<1x16xf32, #tpu.memory_space<vmem>>, vector<1x16xf32>,
    return
  }
  func.func @transform_0(%arg0: i32) -> (i32, i32) {
    %c0_i32 = arith.constant 0 : i32
    %c0_i32_0 = arith.constant 0 : i32
    return %arg0, %c0_i32 : i32, i32
  }
  func.func @transform_1(%arg0: i32) -> (i32, i32) {
    %c0_i32 = arith.constant 0 : i32
    %c0_i32_0 = arith.constant 0 : i32
    %c0_i32_1 = arith.constant 0 : i32
    return %c0_i32, %c0_i32_0 : i32, i32
  }
  func.func @transform_2(%arg0: i32) -> (i32, i32) {
    %c0_i32 = arith.constant 0 : i32
    %c0_i32_0 = arith.constant 0 : i32
    %c0_i32_1 = arith.constant 0 : i32
    return %c0_i32, %c0_i32_0 : i32, i32
  }
  func.func @transform_3(%arg0: i32) -> (i32, i32) {
    %c0_i32 = arith.constant 0 : i32
    %c0_i32_0 = arith.constant 0 : i32
    %c0_i32_1 = arith.constant 0 : i32
    return %c0_i32, %c0_i32_0 : i32, i32
  }
  func.func @transform_4(%arg0: i32) -> (i32, i32) {
    %c0_i32 = arith.constant 0 : i32
    %c0_i32_0 = arith.constant 0 : i32
    %c0_i32_1 = arith.constant 0 : i32
    return %c0_i32, %c0_i32_0 : i32, i32
  }
  func.func @transform_5(%arg0: i32) -> (i32, i32) {
    %c0_i32 = arith.constant 0 : i32
    %c0_i32_0 = arith.constant 0 : i32
    return %c0_i32, %arg0 : i32, i32
  }
}

</mosaic_0001>

<bundles_post_ra>
// kernel: tpu_custom_call.1
= control target key start
LH: loop header
LB: loop body
LE: loop exit
PB: predicated region body
PF: predicated region fallthrough
CT: control target
= control target key end

     0   :  { %11 = vsyncpa [#allocation4], 0  ;;  %s812_s0 = inlined_call_operand.hbm [shape: bf16[16,512], index: 0, kind: input, shape index: {}]   ;;  %s813_s1 = inlined_call_operand.hbm [shape: bf16[512,128], index: 1, kind: input, shape index: {}]   ;;  %s814_s2 = inlined_call_operand.vmem [shape: f32[1,128], index: 2, kind: input, shape index: {}]   ;;  %s815_s3 = inlined_call_operand.vmem [shape: f32[1,128], index: 3, kind: input, shape index: {}]   ;;  %s816_s4 = inlined_call_operand.<no memory space> [shape: f32[1,1], index: 4, kind: input, shape index: {}]   ;;  %s817_s5 = inlined_call_operand.hbm [shape: f32[1,16], index: 5, kind: output, shape index: {}]  }
   0x1   :  { %12 = vsyncpa [#allocation7], 0 }
   0x2   :  { %13 = vsyncpa [#allocation5], 0  ;;  %s727_s18 = smov [#allocation3]   ;;  %s655_s22 = scalar_lea.hbm %s812_s0, 512 }
   0x3   :  { %s19_s19 = sshll.u32 %s727_s18, 4  ;;  %p656_p0 = scmp.ne.s32.totalorder %s812_s0, %s655_s22  ;;  %s20_s19 = int_to_ptr.vmem [resolvable:$true] %s19_s19 }
   0x4   :  { %p659_p1 = scmp.lt.u32.totalorder %s655_s22, %s812_s0 }
   0x6   :  { %p661_p2 = pnand %p659_p1, %p656_p0 }
   0x8   :  { %664 = shalt.err (!%p661_p2)
}
   0x9   :  { %s665_s27 = scalar_lea.vmem %s20_s19, 512  ;;  %p670_p4 = scmp.lt.s32.totalorder %s20_s19, %s20_s19 }
   0xa   :  { %p666_p3 = scmp.ne.s32.totalorder %s20_s19, %s665_s27  ;;  %p671_p5 = scmp.lt.s32.totalorder %s665_s27, %s665_s27 }
   0xc   :  { %p672_p6 = por %p671_p5, %p670_p4 }
   0xe   :  { %p673_p7 = pnand %p672_p6, %p666_p3 }
  0x10   :  { %676 = shalt.err (!%p673_p7)
}
  0x11   :  { %s728_s28 = smov 256   ;;  %s729_s29 = smov 16  }
  0x12   :  { %25 = dma.hbm_to_vmem [thread:$0]  %s812_s0, 512, %s20_s19, [#allocation4], %s728_s28, %s728_s28, %s729_s29  }
  0x13   :  { %s730_s7 = smov [#allocation6]   ;;  %s677_s11 = scalar_lea.hbm %s813_s1, 4096 }
  0x14   :  { %s31_s8 = sshll.u32 %s730_s7, 4  ;;  %p678_p8 = scmp.ne.s32.totalorder %s813_s1, %s677_s11  ;;  %s32_s8 = int_to_ptr.vmem [resolvable:$true] %s31_s8 }
  0x15   :  { %p681_p9 = scmp.lt.u32.totalorder %s677_s11, %s813_s1 }
  0x17   :  { %p683_p10 = pnand %p681_p9, %p678_p8 }
  0x19   :  { %686 = shalt.err (!%p683_p10)
}
  0x1a   :  { %s687_s16 = scalar_lea.vmem %s32_s8, 4096  ;;  %p692_p12 = scmp.lt.s32.totalorder %s32_s8, %s32_s8 }
  0x1b   :  { %p688_p11 = scmp.ne.s32.totalorder %s32_s8, %s687_s16  ;;  %p693_p13 = scmp.lt.s32.totalorder %s687_s16, %s687_s16 }
  0x1d   :  { %p694_p0 = por %p693_p13, %p692_p12 }
  0x1f   :  { %p695_p1 = pnand %p694_p0, %p688_p11 }
  0x21   :  { %698 = shalt.err (!%p695_p1)
}
  0x22   :  { %s731_s0 = smov 64   ;;  %s732_s17 = smov 4  }
  0x23   :  { %37 = dma.hbm_to_vmem [thread:$0]  %s813_s1, 4096, %s32_s8, [#allocation7], %s731_s0, %s731_s0, %s732_s17  }
  0x24   :  { %721 = dma.done.wait [#allocation4], 512  }
  0x25   :  { %722 = vsyncadd [#allocation4], 4294966784 }
  0x26   :  { %723 = dma.done.wait [#allocation7], 4096  }
  0x27   :  { %724 = vsyncadd [#allocation7], 4294963200  ;;  %v617_v0 = vld [vmem:[#allocation6 + $0x40] sm:$0xff]   ;;  %v621_v4 = vld [vmem:[#allocation6 + $0x48] sm:$0xff]   ;;  %v733_v36 = vmov 0.0|0.0   ;;  %vm734_vm0 = vmmov 0   ;;  %v424_v59 = vstv %s816_s4 }
  0x28   :  { %v618_v1 = vld [vmem:[#allocation6 + $0xc0] sm:$0xff]   ;;  %550 = vmatprep.subr.bf16.mxu0 %v617_v0  ;;  %v622_v5 = vld [vmem:[#allocation6 + $0xc8] sm:$0xff]   ;;  %v625_v8 = vld [vmem:[#allocation6 + $0x50] sm:$0xff]   ;;  %v735_v37 = vmov 0.0   ;;  %s736_s24 = smov [#allocation8]   ;;  %vm495_vm1 = vcmask 122880  }
  0x29   :  { %v619_v2 = vld [vmem:[#allocation6] sm:$0xff]   ;;  %572 = vmatprep.subr.bf16.mxu1 %v618_v1  ;;  %v623_v6 = vld [vmem:[#allocation6 + $0x8] sm:$0xff]   ;;  %v626_v9 = vld [vmem:[#allocation6 + $0xd0] sm:$0xff]   ;;  %s503_s25 = sshll.u32 %s736_s24, 4  ;;  %s504_s25 = int_to_ptr.vmem [resolvable:$true] %s503_s25 }
  0x2a   :  { %v620_v3 = vld [vmem:[#allocation6 + $0x80] sm:$0xff]   ;;  %551 = vmatpush3.bf16.msra.mxu0 %v619_v2  ;;  %v624_v7 = vld [vmem:[#allocation6 + $0x88] sm:$0xff]   ;;  %v627_v10 = vld [vmem:[#allocation6 + $0x10] sm:$0xff]   ;;  %s699_s26 = scalar_lea.vmem %s504_s25, 16  ;;  %s703_s27 = scalar_lea.vmem %s504_s25, 32 }
  0x2b   :  { %573 = vmatpush3.bf16.msra.mxu1 %v620_v3  ;;  %552 = vmatprep.subr.bf16.mxu0 %v621_v4  ;;  %v628_v11 = vld [vmem:[#allocation6 + $0x90] sm:$0xff]   ;;  %v629_v12 = vld [vmem:[#allocation6 + $0x58] sm:$0xff]   ;;  %v633_v16 = vld [vmem:[#allocation6 + $0x60] sm:$0xff]   ;;  %p700_p2 = scmp.ne.s32.totalorder %s504_s25, %s699_s26  ;;  %p704_p3 = scmp.lt.s32.totalorder %s504_s25, %s504_s25 }
  0x2c   :  { %574 = vmatprep.subr.bf16.mxu1 %v622_v5  ;;  %v630_v13 = vld [vmem:[#allocation6 + $0xd8] sm:$0xff]   ;;  %v634_v17 = vld [vmem:[#allocation6 + $0xe0] sm:$0xff]   ;;  %v637_v20 = vld [vmem:[#allocation6 + $0x68] sm:$0xff]   ;;  %p705_p4 = scmp.lt.s32.totalorder %s703_s27, %s699_s26 }
  0x2d   :  { %v631_v14 = vld [vmem:[#allocation6 + $0x18] sm:$0xff]   ;;  %v635_v18 = vld [vmem:[#allocation6 + $0x20] sm:$0xff]   ;;  %v638_v21 = vld [vmem:[#allocation6 + $0xe8] sm:$0xff]  }
  0x2e   :  { %553 = vmatpush3.bf16.msra.mxu0 %v623_v6  ;;  %v632_v15 = vld [vmem:[#allocation6 + $0x98] sm:$0xff]   ;;  %v636_v19 = vld [vmem:[#allocation6 + $0xa0] sm:$0xff]   ;;  %v639_v22 = vld [vmem:[#allocation6 + $0x28] sm:$0xff]   ;;  %p706_p5 = por %p705_p4, %p704_p3 }
  0x2f   :  { %575 = vmatpush3.bf16.msra.mxu1 %v624_v7  ;;  %554 = vmatprep.subr.bf16.mxu0 %v625_v8  ;;  %v640_v23 = vld [vmem:[#allocation6 + $0xa8] sm:$0xff]   ;;  %v641_v24 = vld [vmem:[#allocation6 + $0x70] sm:$0xff]   ;;  %v645_v28 = vld [vmem:[#allocation6 + $0x78] sm:$0xff]  }
  0x30   :  { %576 = vmatprep.subr.bf16.mxu1 %v626_v9  ;;  %v642_v25 = vld [vmem:[#allocation6 + $0xf0] sm:$0xff]   ;;  %v646_v29 = vld [vmem:[#allocation6 + $0xf8] sm:$0xff]   ;;  %v513_v40 = vld [vmem:[%s814_s2] ss:$0 sm:$0xff]  ;;  %p707_p6 = pnand %p706_p5, %p700_p2 }
  0x31   :  { %v643_v26 = vld [vmem:[#allocation6 + $0x30] sm:$0xff]   ;;  %v647_v30 = vld [vmem:[#allocation6 + $0x38] sm:$0xff]   ;;  %v422_v58 = vld [vmem:[%s815_s3] sm:$0x1] }
  0x32   :  { %555 = vmatpush3.bf16.msra.mxu0 %v627_v10  ;;  %v644_v27 = vld [vmem:[#allocation6 + $0xb0] sm:$0xff]   ;;  %v648_v31 = vld [vmem:[#allocation6 + $0xb8] sm:$0xff]  }
  0x33   :  { %577 = vmatpush3.bf16.msra.mxu1 %v628_v11  ;;  %556 = vmatprep.subr.bf16.mxu0 %v629_v12  ;;  %v649_v32 = vld [vmem:[#allocation3] ss:$16 sps:$4 sm:$0xff]   ;;  %v651_v33 = vld [vmem:[#allocation3 + $0x4] ss:$16 sps:$4 sm:$0xff]   ;;  %v652_v34 = vld [vmem:[#allocation3 + $0x8] ss:$16 sps:$4 sm:$0xff]  }
  0x34   :  { %578 = vmatprep.subr.bf16.mxu1 %v630_v13  ;;  %v654_v35 = vld [vmem:[#allocation3 + $0xc] ss:$16 sps:$4 sm:$0xff]   ;;  %370 = vmatprep.mubr.bf16.mxu0 %v651_v33 }
  0x35   :  { %411 = vmatprep.mubr.bf16.mxu1 %v654_v35 }
  0x36   :  { %557 = vmatpush3.bf16.msra.mxu0 %v631_v14 }
  0x37   :  { %579 = vmatpush3.bf16.msra.mxu1 %v632_v15  ;;  %558 = vmatprep.subr.bf16.mxu0 %v633_v16 }
  0x38   :  { %580 = vmatprep.subr.bf16.mxu1 %v634_v17 }
  0x3a   :  { %559 = vmatpush3.bf16.msra.mxu0 %v635_v18 }
  0x3b   :  { %581 = vmatpush3.bf16.msra.mxu1 %v636_v19  ;;  %560 = vmatprep.subr.bf16.mxu0 %v637_v20 }
  0x3c   :  { %582 = vmatprep.subr.bf16.mxu1 %v638_v21 }
  0x3e   :  { %561 = vmatpush3.bf16.msra.mxu0 %v639_v22 }
  0x3f   :  { %583 = vmatpush3.bf16.msra.mxu1 %v640_v23  ;;  %562 = vmatprep.subr.bf16.mxu0 %v641_v24 }
  0x40   :  { %584 = vmatprep.subr.bf16.mxu1 %v642_v25 }
  0x42   :  { %563 = vmatpush3.bf16.msra.mxu0 %v643_v26 }
  0x43   :  { %585 = vmatpush3.bf16.msra.mxu1 %v644_v27  ;;  %564 = vmatprep.subr.bf16.mxu0 %v645_v28 }
  0x44   :  { %586 = vmatprep.subr.bf16.mxu1 %v646_v29 }
  0x46   :  { %565 = vmatpush3.bf16.msra.mxu0 %v647_v30 }
  0x47   :  { %587 = vmatpush3.bf16.msra.mxu1 %v648_v31  ;;  %604 = vmatprep.subr.bf16.mxu0 %v733_v36 }
  0x49   :  { %371 = vmatmul.mubr.bf16.vlgmr.msra.gmra.mrb[0].mxu0 %v649_v32 }
  0x4a   :  { %412 = vmatmul.mubr.bf16.vlgmr.msra.gmra.mrb[0].mxu1 %v652_v34  ;;  %601 = vmatprep.mubr.msk.f32.mxu0 %vm734_vm0, %v735_v37 }
 0x11c   :  { %v566_v38 = vpop.f32.mrb[0].mxu0 }
 0x11d   :  { %v588_v39 = vpop.f32.mrb[0].mxu1  ;;  %v567_v41 = vpop.f32.mrb[1].mxu0 }
 0x11e   :  { %v568_v42 = vadd.f32 %v567_v41, %v566_v38  ;;  %v589_v43 = vpop.f32.mrb[1].mxu1  ;;  %v569_v44 = vpop.f32.mrb[2].mxu0 }
 0x11f   :  { %v590_v45 = vadd.f32 %v589_v43, %v588_v39  ;;  %v591_v46 = vpop.f32.mrb[2].mxu1  ;;  %v570_v47 = vpop.f32.mrb[3].mxu0 }
 0x120   :  { %v373_v48 = vadd.f32 %v568_v42, %v513_v40  ;;  %v571_v49 = vadd.f32 %v570_v47, %v569_v44  ;;  %v592_v50 = vpop.f32.mrb[3].mxu1 }
 0x121   :  { %v593_v51 = vadd.f32 %v592_v50, %v591_v46 }
 0x122   :  { %v414_v52 = vadd.f32 %v590_v45, %v373_v48  ;;  %v376_v53 = vadd.f32 %v571_v49, %v513_v40 }
 0x124   :  { %v417_v54 = vadd.f32 %v593_v51, %v376_v53  ;;  %v420_v55 = vmax.f32 %v414_v52, 0.0 }
 0x126   :  { %v421_v56 = vmax.f32 %v417_v54, 0.0 }
 0x128   :  { %v605_v57 = vpack.c.bf16 %v421_v56, %v420_v55 }
 0x12a   :  { %606 = vmatpush3.bf16.xpose.msra.mxu0 %v605_v57 }
 0x131   :  { %602 = vmatmul.mubr.f32.vlgmr.msra.gmra.mrb[4].mxu0 %v422_v58 }
 0x204   :  { %v491_v60 = vpop.f32.mrb[4].mxu0 }
 0x205   :  { %v492_v61 = vadd.f32 %v491_v60, %v424_v59  ;;  %v603_v62 = vpop.f32.mrb[5].mxu0 }
 0x207   :  { %496 = vst.msk [vmem:[#allocation8] sm:$0x1] %vm495_vm1, %v492_v61 }
 0x208   :  { %710 = shalt.err (!%p707_p6)
}
 0x209   :  { %s711_s4 = scalar_lea.hbm %s817_s5, 16 }
 0x20a   :  { %p712_p7 = scmp.ne.s32.totalorder %s817_s5, %s711_s4  ;;  %p715_p8 = scmp.lt.u32.totalorder %s711_s4, %s817_s5 }
 0x20c   :  { %p717_p9 = pnand %p715_p8, %p712_p7 }
 0x20e   :  { %720 = shalt.err (!%p717_p9)
}
 0x20f   :  { %506 = dma.vmem_to_hbm [thread:$0]  %s504_s25, 16, %s817_s5, [#allocation5]  }
 0x210   :  { %725 = dma.done.wait [#allocation5], 16  }
 0x211   :  { %726 = vsyncadd [#allocation5], 4294967280 }
 0x212   :  { %510 = vsyncpa [#allocation4], 1 }
 0x213   :  { %511 = vsyncpa [#allocation7], 1 }
 0x214   :  { %512 = vsyncpa [#allocation5], 1 }

</bundles_post_ra>
